<compile_context>
chip_gen: v7x
topology: tpu7x:2x2x1
jax: 0.10.0
libtpu: 0.0.40
codegen_flags: <defaults>
</compile_context>

<pallas_src>
import functools
import numpy as np

import jax
import jax.numpy as jnp
from jax.experimental import pallas as pl
from jax.experimental.pallas import tpu as pltpu


# ---------------------------------------------------------------------------
# HSV helpers (shared by the Pallas kernel and the pure-JAX reference, so the
# two paths are numerically identical).  H in degrees [0, 360), S/V >= 0.
# ---------------------------------------------------------------------------

def _floor_mod(x, m):
    return x - m * jnp.floor(x * (1.0 / m))


def _rgb_to_hsv(r, g, b):
    maxc = jnp.maximum(jnp.maximum(r, g), b)
    minc = jnp.minimum(jnp.minimum(r, g), b)
    v = maxc
    delta = maxc - minc
    safe_max = jnp.where(maxc > 0.0, maxc, 1.0)
    s = jnp.where(maxc > 0.0, delta / safe_max, 0.0)
    safe_delta = jnp.where(delta > 0.0, delta, 1.0)
    rc = (g - b) / safe_delta
    gc = (b - r) / safe_delta
    bc = (r - g) / safe_delta
    h6 = jnp.where(
        delta <= 0.0,
        0.0,
        jnp.where(r >= maxc,
                  _floor_mod(rc, 6.0),
                  jnp.where(g >= maxc, gc + 2.0, bc + 4.0)))
    return h6 * 60.0, s, v


def _hsv_to_rgb(h, s, v):
    c = v * s
    hp = h * (1.0 / 60.0)
    x = c * (1.0 - jnp.abs(_floor_mod(hp, 2.0) - 1.0))
    m = v - c
    i = jnp.floor(hp)
    r1 = jnp.where((i == 0.0) | (i == 5.0), c,
                   jnp.where((i == 1.0) | (i == 4.0), x, 0.0))
    g1 = jnp.where((i == 1.0) | (i == 2.0), c,
                   jnp.where((i == 0.0) | (i == 3.0), x, 0.0))
    b1 = jnp.where((i == 3.0) | (i == 4.0), c,
                   jnp.where((i == 2.0) | (i == 5.0), x, 0.0))
    return r1 + m, g1 + m, b1 + m


# ---------------------------------------------------------------------------
# Pallas kernel: one (basis, ray-tile) grid step, all math on dense
# (tile_rows, 128) f32 slabs.
# ---------------------------------------------------------------------------

def _region_edit_kernel(dhsv_ref, *refs, has_weight):
    """
    dhsv_ref : SMEM (3*P,)              per-basis (dH, sS, sV), flattened
    [w_ref]  : VMEM (TR, 128)           per-ray blend weight (only if has_weight)
    rgb_ref  : VMEM (1, 3, TR, 128)     per-basis RGB, channel-major
    out_ref  : VMEM (1, 3, TR, 128)     edited RGB
    """
    if has_weight:
        w_ref, rgb_ref, out_ref = refs
    else:
        rgb_ref, out_ref = refs

    p = pl.program_id(1)

    r = rgb_ref[0, 0, :, :]
    g = rgb_ref[0, 1, :, :]
    b = rgb_ref[0, 2, :, :]

    h, s, v = _rgb_to_hsv(r, g, b)

    dh = dhsv_ref[3 * p + 0]
    ds = dhsv_ref[3 * p + 1]
    dv = dhsv_ref[3 * p + 2]

    h2 = _floor_mod(h + dh + 360.0, 360.0)
    s2 = jnp.maximum(s * ds, 0.0)
    v2 = jnp.maximum(v * dv, 0.0)

    r2, g2, b2 = _hsv_to_rgb(h2, s2, v2)

    if has_weight:
        w = w_ref[...]
        r2 = r + w * (r2 - r)
        g2 = g + w * (g2 - g)
        b2 = b + w * (b2 - b)

    out_ref[0, 0, :, :] = r2
    out_ref[0, 1, :, :] = g2
    out_ref[0, 2, :, :] = b2


# ---------------------------------------------------------------------------
# Wrapper mirroring RegionEdit.forward
# ---------------------------------------------------------------------------

def region_edit_forward(rgbs, delta_hsv,
                        xyz=None, mean_xyz=None, std_xyz=1.0,
                        clip_feat=None, mean_clip=None, std_clip=1.0,
                        weight_mode=False, *, tile_rows=256):
    """Pallas equivalent of RegionEdit.forward.

    rgbs      : (*prefix, P, 3)   per-basis colors
    delta_hsv : (P, 3)            hue shift (deg) + S/V scales
    xyz       : (*prefix, 3)      optional ray positions
    clip_feat : (*prefix, C)      optional clip features
    """
    P = delta_hsv.shape[0]
    prefix = rgbs.shape[:-2]
    N = int(np.prod(prefix)) if len(prefix) > 0 else 1

    rgbs32 = rgbs.astype(jnp.float32).reshape(N, P, 3)

    # ---- per-ray Gaussian weight (cheap reduction, plain JAX) -------------
    weight = None
    if xyz is not None and mean_xyz is not None:
        d = xyz.reshape(N, -1).astype(jnp.float32) \
            - mean_xyz.reshape(1, -1).astype(jnp.float32)
        w = jnp.exp(-jnp.sum(d * d, axis=-1) / std_xyz)
        weight = w if weight is None else weight * w
    if clip_feat is not None and mean_clip is not None:
        d = clip_feat.reshape(N, -1).astype(jnp.float32) \
            - mean_clip.reshape(1, -1).astype(jnp.float32)
        w = jnp.exp(-jnp.sum(d * d, axis=-1) / std_clip)
        weight = w if weight is None else weight * w

    if weight_mode:
        w_full = jnp.ones((N,), jnp.float32) if weight is None else weight
        out = jnp.broadcast_to(w_full[:, None, None], (N, P, 3))
        return out.reshape(*prefix, P, 3)

    has_weight = weight is not None

    # ---- dense lane/sublane layout: (P, 3, Nr, 128) -----------------------
    LANES = 128
    tile_rows = max(8, (int(tile_rows) + 7) // 8 * 8)
    nr_raw = -(-N // LANES)                               # ceil(N / 128)
    tr = min(tile_rows, ((nr_raw + 7) // 8) * 8)
    nr = ((nr_raw + tr - 1) // tr) * tr
    n_pad = nr * LANES
    pad = n_pad - N

    rgb_cm = jnp.transpose(rgbs32, (1, 2, 0))             # (P, 3, N)
    if pad:
        rgb_cm = jnp.pad(rgb_cm, ((0, 0), (0, 0), (0, pad)))
    rgb_cm = rgb_cm.reshape(P, 3, nr, LANES)

    dhsv_flat = delta_hsv.astype(jnp.float32).reshape(3 * P)

    in_specs = [pl.BlockSpec(memory_space=pltpu.MemorySpace.SMEM)]   # delta_hsv
    args = [dhsv_flat]
    if has_weight:
        w_pad = jnp.pad(weight, ((0, pad),)) if pad else weight
        w2d = w_pad.reshape(nr, LANES)
        in_specs.append(pl.BlockSpec((tr, LANES), lambda t, p: (t, 0)))
        args.append(w2d)
    in_specs.append(pl.BlockSpec((1, 3, tr, LANES), lambda t, p: (p, 0, t, 0)))
    args.append(rgb_cm)

    out_cm = pl.pallas_call(
        functools.partial(_region_edit_kernel, has_weight=has_weight),
        out_shape=jax.ShapeDtypeStruct((P, 3, nr, LANES), jnp.float32),
        grid=(nr // tr, P),
        in_specs=in_specs,
        out_specs=pl.BlockSpec((1, 3, tr, LANES), lambda t, p: (p, 0, t, 0)),
        compiler_params=pltpu.CompilerParams(
            dimension_semantics=("parallel", "parallel")),
    )(*args)

    out = out_cm.reshape(P, 3, n_pad)[:, :, :N]           # drop padding
    out = jnp.transpose(out, (2, 0, 1))                   # (N, P, 3)
    return out.reshape(*prefix, P, 3)


# ---------------------------------------------------------------------------
# Pure-JAX reference mirroring the PyTorch forward
# ---------------------------------------------------------------------------

def region_edit_ref(rgbs, delta_hsv,
                    xyz=None, mean_xyz=None, std_xyz=1.0,
                    clip_feat=None, mean_clip=None, std_clip=1.0,
                    weight_mode=False):
    rgbs = rgbs.astype(jnp.float32)
    r, g, b = rgbs[..., 0], rgbs[..., 1], rgbs[..., 2]
    h, s, v = _rgb_to_hsv(r, g, b)

    weight = jnp.ones_like(rgbs[..., 0:1, 0])
    if xyz is not None and mean_xyz is not None:
        d = xyz.astype(jnp.float32) - mean_xyz.astype(jnp.float32)[None, ...]
        weight = weight * jnp.exp(-jnp.sum(d * d, axis=-1, keepdims=True) / std_xyz)
    if clip_feat is not None and mean_clip is not None:
        d = clip_feat.astype(jnp.float32) - mean_clip.astype(jnp.float32)[None, ...]
        weight = weight * jnp.exp(-jnp.sum(d * d, axis=-1, keepdims=True) / std_clip)

    dh = delta_hsv[..., 0].astype(jnp.float32)
    ds = delta_hsv[..., 1].astype(jnp.float32)
    dv = delta_hsv[..., 2].astype(jnp.float32)
    h2 = _floor_mod(h + dh + 360.0, 360.0)
    s2 = jnp.maximum(s * ds, 0.0)
    v2 = jnp.maximum(v * dv, 0.0)
    r2, g2, b2 = _hsv_to_rgb(h2, s2, v2)
    rgb_new = jnp.stack([r2, g2, b2], axis=-1)

    if weight_mode:
        return jnp.broadcast_to(weight[..., None], rgbs.shape)
    return rgbs + weight[..., None] * (rgb_new - rgbs)


# ---------------------------------------------------------------------------

if __name__ == "__main__":
    key = jax.random.PRNGKey(0)
    num_basis = 4
    prefix = (2, 128)          # 256 rays
    clip_dim = 16

    k = jax.random.split(key, 8)
    rgbs = jax.random.uniform(k[0], (*prefix, num_basis, 3), jnp.float32)
    xyz = jax.random.normal(k[1], (*prefix, 3), jnp.float32)
    clip_feat = jax.random.normal(k[2], (*prefix, clip_dim), jnp.float32)
    mean_xyz = jax.random.normal(k[3], (3,), jnp.float32)
    mean_clip = jax.random.normal(k[4], (clip_dim,), jnp.float32)
    std_xyz, std_clip = 2.0, 50.0

    # delta_hsv as produced by update_delta_hsv: hue shift (deg), S/V scales
    delta_hsv = jnp.stack([
        jax.random.uniform(k[5], (num_basis,), jnp.float32) * 360.0,
        0.5 + jax.random.uniform(k[6], (num_basis,), jnp.float32),
        0.5 + jax.random.uniform(k[7], (num_basis,), jnp.float32),
    ], axis=-1)

    # full path (xyz + clip weighting)
    out = region_edit_forward(rgbs, delta_hsv,
                              xyz=xyz, mean_xyz=mean_xyz, std_xyz=std_xyz,
                              clip_feat=clip_feat, mean_clip=mean_clip,
                              std_clip=std_clip)
    out = jax.block_until_ready(out)
    ref = region_edit_ref(rgbs, delta_hsv,
                          xyz=xyz, mean_xyz=mean_xyz, std_xyz=std_xyz,
                          clip_feat=clip_feat, mean_clip=mean_clip,
                          std_clip=std_clip)
    assert out.shape == (*prefix, num_basis, 3), out.shape
    err = float(jnp.max(jnp.abs(out - ref)))
    assert err < 1e-4, err

    # specialized path: no region weighting (kernel skips the weight stream)
    out2 = jax.block_until_ready(region_edit_forward(rgbs, delta_hsv))
    ref2 = region_edit_ref(rgbs, delta_hsv)
    err2 = float(jnp.max(jnp.abs(out2 - ref2)))
    assert err2 < 1e-4, err2

    # weight_mode (pure broadcast, handled in the wrapper)
    wm = region_edit_forward(rgbs, delta_hsv,
                             xyz=xyz, mean_xyz=mean_xyz, std_xyz=std_xyz,
                             weight_mode=True)
    wm_ref = region_edit_ref(rgbs, delta_hsv,
                             xyz=xyz, mean_xyz=mean_xyz, std_xyz=std_xyz,
                             weight_mode=True)
    assert float(jnp.max(jnp.abs(wm - wm_ref))) < 1e-5

    print("KERNEL_OK")
</pallas_src>

<mosaic_0001>
module attributes {stable_mosaic.version = 11 : i64} {
  func.func @_region_edit_kernel(%arg0: i32, %arg1: i32, %arg2: memref<12xf32, #tpu.memory_space<smem>>, %arg3: memref<8x128xf32, #tpu.memory_space<vmem>>, %arg4: memref<1x3x8x128xf32, #tpu.memory_space<vmem>>, %arg5: memref<1x3x8x128xf32, #tpu.memory_space<vmem>>) attributes {dimension_semantics = [#tpu.dimension_semantics<parallel>, #tpu.dimension_semantics<parallel>], iteration_bounds = array<i64: 1, 4>, scalar_prefetch = 0 : i64, scratch_operands = 0 : i64, tpu.core_type = #tpu.core_type<tc>, window_params = [{transform_indices = @transform_0, window_bounds = array<i64: 12>}, {transform_indices = @transform_1, window_bounds = array<i64: 8, 128>}, {transform_indices = @transform_2, window_bounds = array<i64: 1, 3, 8, 128>}, {transform_indices = @transform_3, window_bounds = array<i64: 1, 3, 8, 128>}]} {
    %c0 = arith.constant 0 : index
    %c0_0 = arith.constant 0 : index
    %c0_1 = arith.constant 0 : index
    %c0_2 = arith.constant 0 : index
    %0 = vector.load %arg4[%c0, %c0_0, %c0_1, %c0_2] : memref<1x3x8x128xf32, #tpu.memory_space<vmem>>, vector<1x1x8x128xf32>
    %1 = vector.shape_cast %0 : vector<1x1x8x128xf32> to vector<8x128xf32>
    %c0_3 = arith.constant 0 : index
    %c1 = arith.constant 1 : index
    %c0_4 = arith.constant 0 : index
    %c0_5 = arith.constant 0 : index
    %2 = vector.load %arg4[%c0_3, %c1, %c0_4, %c0_5] : memref<1x3x8x128xf32, #tpu.memory_space<vmem>>, vector<1x1x8x128xf32>
    %3 = vector.shape_cast %2 : vector<1x1x8x128xf32> to vector<8x128xf32>
    %c0_6 = arith.constant 0 : index
    %c2 = arith.constant 2 : index
    %c0_7 = arith.constant 0 : index
    %c0_8 = arith.constant 0 : index
    %4 = vector.load %arg4[%c0_6, %c2, %c0_7, %c0_8] : memref<1x3x8x128xf32, #tpu.memory_space<vmem>>, vector<1x1x8x128xf32>
    %5 = vector.shape_cast %4 : vector<1x1x8x128xf32> to vector<8x128xf32>
    %6 = arith.maximumf %1, %3 : vector<8x128xf32>
    %7 = arith.maximumf %6, %5 : vector<8x128xf32>
    %8 = arith.minimumf %1, %3 : vector<8x128xf32>
    %9 = arith.minimumf %8, %5 : vector<8x128xf32>
    %10 = arith.subf %7, %9 : vector<8x128xf32>
    %cst = arith.constant 0.000000e+00 : f32
    %11 = vector.broadcast %cst : f32 to vector<8x128xf32>
    %12 = arith.cmpf ogt, %7, %11 : vector<8x128xf32>
    %cst_9 = arith.constant 1.000000e+00 : f32
    %13 = vector.broadcast %cst_9 : f32 to vector<8x128xf32>
    %14 = arith.select %12, %7, %13 : vector<8x128xi1>, vector<8x128xf32>
    %cst_10 = arith.constant 0.000000e+00 : f32
    %15 = vector.broadcast %cst_10 : f32 to vector<8x128xf32>
    %16 = arith.cmpf ogt, %7, %15 : vector<8x128xf32>
    %17 = arith.divf %10, %14 : vector<8x128xf32>
    %cst_11 = arith.constant 0.000000e+00 : f32
    %18 = vector.broadcast %cst_11 : f32 to vector<8x128xf32>
    %19 = arith.select %16, %17, %18 : vector<8x128xi1>, vector<8x128xf32>
    %cst_12 = arith.constant 0.000000e+00 : f32
    %20 = vector.broadcast %cst_12 : f32 to vector<8x128xf32>
    %21 = arith.cmpf ogt, %10, %20 : vector<8x128xf32>
    %cst_13 = arith.constant 1.000000e+00 : f32
    %22 = vector.broadcast %cst_13 : f32 to vector<8x128xf32>
    %23 = arith.select %21, %10, %22 : vector<8x128xi1>, vector<8x128xf32>
    %24 = arith.subf %3, %5 : vector<8x128xf32>
    %25 = arith.divf %24, %23 : vector<8x128xf32>
    %26 = arith.subf %5, %1 : vector<8x128xf32>
    %27 = arith.divf %26, %23 : vector<8x128xf32>
    %28 = arith.subf %1, %3 : vector<8x128xf32>
    %29 = arith.divf %28, %23 : vector<8x128xf32>
    %cst_14 = arith.constant 0.000000e+00 : f32
    %30 = vector.broadcast %cst_14 : f32 to vector<8x128xf32>
    %31 = arith.cmpf ole, %10, %30 : vector<8x128xf32>
    %32 = arith.cmpf oge, %1, %7 : vector<8x128xf32>
    %cst_15 = arith.constant 0.166666672 : f32
    %33 = vector.broadcast %cst_15 : f32 to vector<8x128xf32>
    %34 = arith.mulf %25, %33 : vector<8x128xf32>
    %35 = math.floor %34 : vector<8x128xf32>
    %cst_16 = arith.constant 6.000000e+00 : f32
    %36 = vector.broadcast %cst_16 : f32 to vector<8x128xf32>
    %37 = arith.mulf %36, %35 : vector<8x128xf32>
    %38 = arith.subf %25, %37 : vector<8x128xf32>
    %39 = arith.cmpf oge, %3, %7 : vector<8x128xf32>
    %cst_17 = arith.constant 2.000000e+00 : f32
    %40 = vector.broadcast %cst_17 : f32 to vector<8x128xf32>
    %41 = arith.addf %27, %40 : vector<8x128xf32>
    %cst_18 = arith.constant 4.000000e+00 : f32
    %42 = vector.broadcast %cst_18 : f32 to vector<8x128xf32>
    %43 = arith.addf %29, %42 : vector<8x128xf32>
    %44 = arith.select %39, %41, %43 : vector<8x128xi1>, vector<8x128xf32>
    %45 = arith.select %32, %38, %44 : vector<8x128xi1>, vector<8x128xf32>
    %cst_19 = arith.constant 0.000000e+00 : f32
    %46 = vector.broadcast %cst_19 : f32 to vector<8x128xf32>
    %47 = arith.select %31, %46, %45 : vector<8x128xi1>, vector<8x128xf32>
    %cst_20 = arith.constant 6.000000e+01 : f32
    %48 = vector.broadcast %cst_20 : f32 to vector<8x128xf32>
    %49 = arith.mulf %47, %48 : vector<8x128xf32>
    %c3_i32 = arith.constant 3 : i32
    %50 = arith.muli %c3_i32, %arg1 : i32
    %c0_i32 = arith.constant 0 : i32
    %51 = arith.addi %50, %c0_i32 : i32
    %52 = arith.index_cast %51 : i32 to index
    %53 = memref.load %arg2[%52] : memref<12xf32, #tpu.memory_space<smem>>
    %c3_i32_21 = arith.constant 3 : i32
    %54 = arith.muli %c3_i32_21, %arg1 : i32
    %c1_i32 = arith.constant 1 : i32
    %55 = arith.addi %54, %c1_i32 : i32
    %56 = arith.index_cast %55 : i32 to index
    %57 = memref.load %arg2[%56] : memref<12xf32, #tpu.memory_space<smem>>
    %c3_i32_22 = arith.constant 3 : i32
    %58 = arith.muli %c3_i32_22, %arg1 : i32
    %c2_i32 = arith.constant 2 : i32
    %59 = arith.addi %58, %c2_i32 : i32
    %60 = arith.index_cast %59 : i32 to index
    %61 = memref.load %arg2[%60] : memref<12xf32, #tpu.memory_space<smem>>
    %62 = vector.broadcast %53 : f32 to vector<8x128xf32>
    %63 = arith.addf %49, %62 : vector<8x128xf32>
    %cst_23 = arith.constant 3.600000e+02 : f32
    %64 = vector.broadcast %cst_23 : f32 to vector<8x128xf32>
    %65 = arith.addf %63, %64 : vector<8x128xf32>
    %cst_24 = arith.constant 0.00277777785 : f32
    %66 = vector.broadcast %cst_24 : f32 to vector<8x128xf32>
    %67 = arith.mulf %65, %66 : vector<8x128xf32>
    %68 = math.floor %67 : vector<8x128xf32>
    %cst_25 = arith.constant 3.600000e+02 : f32
    %69 = vector.broadcast %cst_25 : f32 to vector<8x128xf32>
    %70 = arith.mulf %69, %68 : vector<8x128xf32>
    %71 = arith.subf %65, %70 : vector<8x128xf32>
    %72 = vector.broadcast %57 : f32 to vector<8x128xf32>
    %73 = arith.mulf %19, %72 : vector<8x128xf32>
    %cst_26 = arith.constant 0.000000e+00 : f32
    %74 = vector.broadcast %cst_26 : f32 to vector<8x128xf32>
    %75 = arith.maximumf %73, %74 : vector<8x128xf32>
    %76 = vector.broadcast %61 : f32 to vector<8x128xf32>
    %77 = arith.mulf %7, %76 : vector<8x128xf32>
    %cst_27 = arith.constant 0.000000e+00 : f32
    %78 = vector.broadcast %cst_27 : f32 to vector<8x128xf32>
    %79 = arith.maximumf %77, %78 : vector<8x128xf32>
    %80 = arith.mulf %79, %75 : vector<8x128xf32>
    %cst_28 = arith.constant 0.0166666675 : f32
    %81 = vector.broadcast %cst_28 : f32 to vector<8x128xf32>
    %82 = arith.mulf %71, %81 : vector<8x128xf32>
    %cst_29 = arith.constant 5.000000e-01 : f32
    %83 = vector.broadcast %cst_29 : f32 to vector<8x128xf32>
    %84 = arith.mulf %82, %83 : vector<8x128xf32>
    %85 = math.floor %84 : vector<8x128xf32>
    %cst_30 = arith.constant 2.000000e+00 : f32
    %86 = vector.broadcast %cst_30 : f32 to vector<8x128xf32>
    %87 = arith.mulf %86, %85 : vector<8x128xf32>
    %88 = arith.subf %82, %87 : vector<8x128xf32>
    %cst_31 = arith.constant 1.000000e+00 : f32
    %89 = vector.broadcast %cst_31 : f32 to vector<8x128xf32>
    %90 = arith.subf %88, %89 : vector<8x128xf32>
    %91 = math.absf %90 : vector<8x128xf32>
    %cst_32 = arith.constant 1.000000e+00 : f32
    %92 = vector.broadcast %cst_32 : f32 to vector<8x128xf32>
    %93 = arith.subf %92, %91 : vector<8x128xf32>
    %94 = arith.mulf %80, %93 : vector<8x128xf32>
    %95 = arith.subf %79, %80 : vector<8x128xf32>
    %96 = math.floor %82 : vector<8x128xf32>
    %cst_33 = arith.constant 0.000000e+00 : f32
    %97 = vector.broadcast %cst_33 : f32 to vector<8x128xf32>
    %98 = arith.cmpf oeq, %96, %97 : vector<8x128xf32>
    %cst_34 = arith.constant 5.000000e+00 : f32
    %99 = vector.broadcast %cst_34 : f32 to vector<8x128xf32>
    %100 = arith.cmpf oeq, %96, %99 : vector<8x128xf32>
    %101 = arith.ori %98, %100 : vector<8x128xi1>
    %cst_35 = arith.constant 1.000000e+00 : f32
    %102 = vector.broadcast %cst_35 : f32 to vector<8x128xf32>
    %103 = arith.cmpf oeq, %96, %102 : vector<8x128xf32>
    %cst_36 = arith.constant 4.000000e+00 : f32
    %104 = vector.broadcast %cst_36 : f32 to vector<8x128xf32>
    %105 = arith.cmpf oeq, %96, %104 : vector<8x128xf32>
    %106 = arith.ori %103, %105 : vector<8x128xi1>
    %cst_37 = arith.constant 0.000000e+00 : f32
    %107 = vector.broadcast %cst_37 : f32 to vector<8x128xf32>
    %108 = arith.select %106, %94, %107 : vector<8x128xi1>, vector<8x128xf32>
    %109 = arith.select %101, %80, %108 : vector<8x128xi1>, vector<8x128xf32>
    %cst_38 = arith.constant 1.000000e+00 : f32
    %110 = vector.broadcast %cst_38 : f32 to vector<8x128xf32>
    %111 = arith.cmpf oeq, %96, %110 : vector<8x128xf32>
    %cst_39 = arith.constant 2.000000e+00 : f32
    %112 = vector.broadcast %cst_39 : f32 to vector<8x128xf32>
    %113 = arith.cmpf oeq, %96, %112 : vector<8x128xf32>
    %114 = arith.ori %111, %113 : vector<8x128xi1>
    %cst_40 = arith.constant 0.000000e+00 : f32
    %115 = vector.broadcast %cst_40 : f32 to vector<8x128xf32>
    %116 = arith.cmpf oeq, %96, %115 : vector<8x128xf32>
    %cst_41 = arith.constant 3.000000e+00 : f32
    %117 = vector.broadcast %cst_41 : f32 to vector<8x128xf32>
    %118 = arith.cmpf oeq, %96, %117 : vector<8x128xf32>
    %119 = arith.ori %116, %118 : vector<8x128xi1>
    %cst_42 = arith.constant 0.000000e+00 : f32
    %120 = vector.broadcast %cst_42 : f32 to vector<8x128xf32>
    %121 = arith.select %119, %94, %120 : vector<8x128xi1>, vector<8x128xf32>
    %122 = arith.select %114, %80, %121 : vector<8x128xi1>, vector<8x128xf32>
    %cst_43 = arith.constant 3.000000e+00 : f32
    %123 = vector.broadcast %cst_43 : f32 to vector<8x128xf32>
    %124 = arith.cmpf oeq, %96, %123 : vector<8x128xf32>
    %cst_44 = arith.constant 4.000000e+00 : f32
    %125 = vector.broadcast %cst_44 : f32 to vector<8x128xf32>
    %126 = arith.cmpf oeq, %96, %125 : vector<8x128xf32>
    %127 = arith.ori %124, %126 : vector<8x128xi1>
    %cst_45 = arith.constant 2.000000e+00 : f32
    %128 = vector.broadcast %cst_45 : f32 to vector<8x128xf32>
    %129 = arith.cmpf oeq, %96, %128 : vector<8x128xf32>
    %cst_46 = arith.constant 5.000000e+00 : f32
    %130 = vector.broadcast %cst_46 : f32 to vector<8x128xf32>
    %131 = arith.cmpf oeq, %96, %130 : vector<8x128xf32>
    %132 = arith.ori %129, %131 : vector<8x128xi1>
    %cst_47 = arith.constant 0.000000e+00 : f32
    %133 = vector.broadcast %cst_47 : f32 to vector<8x128xf32>
    %134 = arith.select %132, %94, %133 : vector<8x128xi1>, vector<8x128xf32>
    %135 = arith.select %127, %80, %134 : vector<8x128xi1>, vector<8x128xf32>
    %136 = arith.addf %109, %95 : vector<8x128xf32>
    %137 = arith.addf %122, %95 : vector<8x128xf32>
    %138 = arith.addf %135, %95 : vector<8x128xf32>
    %c0_48 = arith.constant 0 : index
    %c0_49 = arith.constant 0 : index
    %139 = vector.load %arg3[%c0_48, %c0_49] : memref<8x128xf32, #tpu.memory_space<vmem>>, vector<8x128xf32>
    %140 = arith.subf %136, %1 : vector<8x128xf32>
    %141 = arith.mulf %139, %140 : vector<8x128xf32>
    %142 = arith.addf %1, %141 : vector<8x128xf32>
    %143 = arith.subf %137, %3 : vector<8x128xf32>
    %144 = arith.mulf %139, %143 : vector<8x128xf32>
    %145 = arith.addf %3, %144 : vector<8x128xf32>
    %146 = arith.subf %138, %5 : vector<8x128xf32>
    %147 = arith.mulf %139, %146 : vector<8x128xf32>
    %148 = arith.addf %5, %147 : vector<8x128xf32>
    %c0_50 = arith.constant 0 : index
    %c0_51 = arith.constant 0 : index
    %c0_52 = arith.constant 0 : index
    %c0_53 = arith.constant 0 : index
    %149 = vector.load %arg5[%c0_50, %c0_51, %c0_52, %c0_53] : memref<1x3x8x128xf32, #tpu.memory_space<vmem>>, vector<1x1x8x128xf32>
    %150 = vector.shape_cast %149 : vector<1x1x8x128xf32> to vector<8x128xf32>
    %151 = vector.shape_cast %142 : vector<8x128xf32> to vector<1x1x8x128xf32>
    tpu.vector_store %arg5[%c0_50, %c0_51, %c0_52, %c0_53], %151 {strides = array<i32>} : memref<1x3x8x128xf32, #tpu.memory_space<vmem>>, vector<1x1x8x128xf32>,
    %c0_54 = arith.constant 0 : index
    %c1_55 = arith.constant 1 : index
    %c0_56 = arith.constant 0 : index
    %c0_57 = arith.constant 0 : index
    %152 = vector.load %arg5[%c0_54, %c1_55, %c0_56, %c0_57] : memref<1x3x8x128xf32, #tpu.memory_space<vmem>>, vector<1x1x8x128xf32>
    %153 = vector.shape_cast %152 : vector<1x1x8x128xf32> to vector<8x128xf32>
    %154 = vector.shape_cast %145 : vector<8x128xf32> to vector<1x1x8x128xf32>
    tpu.vector_store %arg5[%c0_54, %c1_55, %c0_56, %c0_57], %154 {strides = array<i32>} : memref<1x3x8x128xf32, #tpu.memory_space<vmem>>, vector<1x1x8x128xf32>,
    %c0_58 = arith.constant 0 : index
    %c2_59 = arith.constant 2 : index
    %c0_60 = arith.constant 0 : index
    %c0_61 = arith.constant 0 : index
    %155 = vector.load %arg5[%c0_58, %c2_59, %c0_60, %c0_61] : memref<1x3x8x128xf32, #tpu.memory_space<vmem>>, vector<1x1x8x128xf32>
    %156 = vector.shape_cast %155 : vector<1x1x8x128xf32> to vector<8x128xf32>
    %157 = vector.shape_cast %148 : vector<8x128xf32> to vector<1x1x8x128xf32>
    tpu.vector_store %arg5[%c0_58, %c2_59, %c0_60, %c0_61], %157 {strides = array<i32>} : memref<1x3x8x128xf32, #tpu.memory_space<vmem>>, vector<1x1x8x128xf32>,
    return
  }
  func.func @transform_0(%arg0: i32, %arg1: i32) -> i32 {
    %c0_i32 = arith.constant 0 : i32
    %c0_i32_0 = arith.constant 0 : i32
    return %c0_i32 : i32
  }
  func.func @transform_1(%arg0: i32, %arg1: i32) -> (i32, i32) {
    %c0_i32 = arith.constant 0 : i32
    %c0_i32_0 = arith.constant 0 : i32
    return %arg0, %c0_i32 : i32, i32
  }
  func.func @transform_2(%arg0: i32, %arg1: i32) -> (i32, i32, i32, i32) {
    %c0_i32 = arith.constant 0 : i32
    %c0_i32_0 = arith.constant 0 : i32
    %c0_i32_1 = arith.constant 0 : i32
    return %arg1, %c0_i32, %arg0, %c0_i32_0 : i32, i32, i32, i32
  }
  func.func @transform_3(%arg0: i32, %arg1: i32) -> (i32, i32, i32, i32) {
    %c0_i32 = arith.constant 0 : i32
    %c0_i32_0 = arith.constant 0 : i32
    %c0_i32_1 = arith.constant 0 : i32
    return %arg1, %c0_i32, %arg0, %c0_i32_0 : i32, i32, i32, i32
  }
}

</mosaic_0001>

<bundles_post_ra>
// kernel: tpu_custom_call.1
= control target key start
LH: loop header
LB: loop body
LE: loop exit
PB: predicated region body
PF: predicated region fallthrough
CT: control target
= control target key end

     0   :  { %8 = vsyncpa [#allocation5], 0  ;;  %s1056_s0 = inlined_call_operand.hbm [shape: f32[12], index: 0, kind: input, shape index: {}]   ;;  %s1057_s1 = inlined_call_operand.hbm [shape: f32[8,128], index: 1, kind: input, shape index: {}]   ;;  %s1058_s2 = inlined_call_operand.hbm [shape: f32[4,3,8,128], index: 2, kind: input, shape index: {}]   ;;  %s1059_s3 = inlined_call_operand.hbm [shape: f32[4,3,8,128], index: 3, kind: output, shape index: {}]  }
   0x1   :  { %9 = vsyncpa [#allocation3], 0 }
   0x2   :  { %10 = vsyncpa [#allocation8], 0 }
   0x3   :  { %12 = vsyncpa [#allocation8 + $0x1], 0 }
   0x4   :  { %13 = vsyncpa [#allocation4], 0 }
   0x5   :  { %15 = vsyncpa [#allocation4 + $0x1], 0  ;;  %s772_s12 = smov 0   ;;  %s774_s13 = smov 0  }
   0x6   :  { %s776_s14 = smov 0   ;;  %s778_s15 = smov 0  }
   0x7   :  { %s780_s16 = smov 0   ;;  %s782_s17 = smov 0  }
   0x8 LB: > { %s468_s18 = sadd.s32 4294967295, %s742_s17   ;;  %s469_s19 = sadd.s32 4294967294, %s742_s17   ;;  %s742_s17 = sphi %s782_s17, %s21_s17   ;;  %s738_s16 = sphi %s780_s16, %s1084_s16   ;;  %s734_s15 = sphi %s778_s15, %s1083_s15   ;;  %s730_s14 = sphi %s776_s14, %s1082_s14   ;;  %s726_s13 = sphi %s774_s13, %s1081_s13   ;;  %s722_s12 = sphi %s772_s12, %s1080_s12  }
   0x9   : > { %p96_p0 = scmp.ne.s32.totalorder %s730_s14, %s726_s13  ;;  %p97_p1 = scmp.eq.s32.totalorder %s742_s17, 0 }
   0xa   : > { %p102_p2 = scmp.ne.s32.totalorder %s726_s13, %s722_s12  ;;  %p810_p3 = scmp.eq.s32.totalorder %s468_s18, 0 }
   0xb   : > { %p128_p4 = scmp.eq.s32.totalorder %s468_s18, 3  ;;  %p98_p5 = por %p97_p1, %p96_p0 }
   0xc   : > { %s1065_s21 = scalar_select %p810_p3, 1, 0 }
   0xd   : > { %p134_p6 = scmp.eq.s32.totalorder %s469_s19, 3  ;;  %p816_p7 = por %p810_p3, %p102_p2 }
   0xe   : > { %p820_p8 = por %p128_p4, %p96_p0  ;;  %p470_p10 = scmp.ge.s32.totalorder %s742_s17, 1 }
   0xf   : > { %s1066_s22 = scalar_select %p816_p7, 1, 0 }
  0x10   : > { %s1067_s23 = scalar_select %p820_p8, 1, 0 }
  0x11   : > { %p824_p9 = por %p134_p6, %p102_p2  ;;  %p141_p11 = scmp.lt.s32.totalorder %s742_s17, 5 }
  0x12   : > { %p519_p13 = scmp.lt.s32.totalorder %s742_s17, 4  ;;  %s744_s27 = smov [#allocation6]  }
  0x13   : > { %s1068_s24 = scalar_select %p824_p9, 1, 0 }
  0x14   : > { %p830_p12 = pnand %p470_p10, %p141_p11  ;;  %p837_p3 = pnand %p519_p13, %p98_p5 }
  0x15   : > { %s165_s28 = sshll.u32 %s744_s27, 4  ;;  %p1071_p0 = scmp.ne.s32.totalorder %s1065_s21, 0  ;;  %s847_s28 = int_to_ptr.vmem [resolvable:$true] %s165_s28 }
  0x16   : > { %s1069_s25 = scalar_select %p830_p12, 1, 0 }
  0x17   : > { %p502_p1 = pneg %p830_p12  ;;  %s30_s30 = sadd.s32 1, %s738_s16 }
  0x18   : > { %p852_p4 = scmp.ge.s32.totalorder %s30_s30, 4  ;;  %s581_s7 = scalar_lea.hbm %s1056_s0, 16 }
  0x19   : > { %p843_p2 = pnand %p502_p1, %p1071_p0  ;;  %p582_p5 = scmp.ne.s32.totalorder %s1056_s0, %s581_s7 }
  0x1a   : > { %p588_p13 = scmp.lt.u32.totalorder %s581_s7, %s1056_s0 }
  0x1b   : > { %p583_p6 = pneg %p843_p2 }
  0x1d   : > { %p584_p10 = pnand %p583_p6, %p582_p5 }
  0x1f   : > { %p585_p11 = pneg %p584_p10 }
  0x21   : > { %p590_p1 = pnand %p588_p13, %p585_p11 }
  0x23   : > { %593 = shalt.err (!%p590_p1)
}
  0x24   : > { %s745_s18 = smov [#allocation2]   ;;  %s594_s8 = scalar_lea.hbm %s1057_s1, 128 }
  0x25   : > { %505 = dma.hbm_to_smem (!%p843_p2), %s1056_s0, 16, %s745_s18, [#allocation5]  }
  0x26   : > { %p595_p0 = scmp.ne.s32.totalorder %s1057_s1, %s594_s8  ;;  %p601_p11 = scmp.lt.u32.totalorder %s594_s8, %s1057_s1 }
  0x28   : > { %p597_p5 = pnand %p595_p0, %p583_p6 }
  0x2a   : > { %p598_p10 = pneg %p597_p5 }
  0x2c   : > { %p603_p13 = pnand %p601_p11, %p598_p10 }
  0x2e   : > { %606 = shalt.err (!%p603_p13)
}
  0x2f   : > { %s607_s11 = scalar_lea.vmem %s847_s28, 128  ;;  %p615_p7 = scmp.lt.s32.totalorder %s847_s28, %s847_s28 }
  0x30   : > { %p608_p1 = scmp.ne.s32.totalorder %s847_s28, %s607_s11  ;;  %p616_p0 = scmp.lt.s32.totalorder %s607_s11, %s607_s11 }
  0x32   : > { %p610_p9 = pnand %p608_p1, %p583_p6  ;;  %p617_p5 = por %p616_p0, %p615_p7 }
  0x34   : > { %p611_p8 = pneg %p610_p9 }
  0x36   : > { %p618_p12 = pnand %p617_p5, %p611_p8 }
  0x38   : > { %621 = shalt.err (!%p618_p12)
}
  0x39   : > { %508 = dma.hbm_to_vmem [thread:$0]  (!%p843_p2), %s1057_s1, 128, %s847_s28, [#allocation3]  }
  0x3a   : > { %s1086_s30 = smov (%p852_p4, %s30_s30), 0  ;;  %s176_s29 = sand.u32 1, %s730_s14  }
  0x3b   : > { %s487_s19 = smul.u32 384, %s738_s16  ;;  %s84_s27 = ssub.s32 %s738_s16, %s1086_s30 }
  0x3c   : > { %p87_p7 = scmp.eq.s32.totalorder %s84_s27, 0  ;;  %s486_s5 = smul.u32 24, %s176_s29 }
  0x3d   : > { %s913_s9 = scalar_lea.hbm %s1058_s2, %s487_s19  ;;  %s1074_s7 = sadd.s32 1, %s730_s14 }
  0x3e   : > { %s918_s28 = scalar_select %p87_p7, %s730_s14, %s1074_s7  }
  0x3f   : > { %s180_s4 = scalar_lea.vmem [#allocation7], %s486_s5  ;;  %s922_s11 = scalar_lea.sflag [#allocation8], %s176_s29 }
  0x40   : > { %s188_s10 = sshll.u32 %s180_s4, 4  ;;  %s622_s20 = scalar_lea.hbm %s913_s9, 384  ;;  %s920_s10 = int_to_ptr.vmem [resolvable:$true] %s188_s10 }
  0x41   : > { %p623_p8 = scmp.ne.s32.totalorder %s913_s9, %s622_s20  ;;  %p624_p9 = pneg %p837_p3 }
  0x42   : > { %s627_s27 = scalar_lea.hbm %s1058_s2, 1536  ;;  %p628_p4 = scmp.lt.u32.totalorder %s913_s9, %s1058_s2 }
  0x43   : > { %p625_p12 = pnand %p624_p9, %p623_p8  ;;  %p629_p6 = scmp.lt.u32.totalorder %s627_s27, %s622_s20 }
  0x44   : > { %p631_p11 = scmp.lt.u32.totalorder %s622_s20, %s913_s9 }
  0x45   : > { %p626_p2 = pneg %p625_p12  ;;  %p630_p10 = por %p629_p6, %p628_p4 }
  0x47   : > { %p632_p13 = por %p631_p11, %p630_p10 }
  0x49   : > { %p633_p1 = pnand %p632_p13, %p626_p2 }
  0x4b   : > { %636 = shalt.err (!%p633_p1)
}
  0x4c   : > { %s637_s29 = scalar_lea.vmem %s920_s10, 384  ;;  %s746_s5 = smov [#allocation7]  }
  0x4d   : > { %p638_p0 = scmp.ne.s32.totalorder %s920_s10, %s637_s29  ;;  %s642_s7 = sshll.u32 %s746_s5, 4  ;;  %s643_s7 = int_to_ptr.vmem [resolvable:$false] %s642_s7 }
  0x4e   : > { %s644_s4 = scalar_lea.vmem %s643_s7, 768  ;;  %p645_p8 = scmp.lt.s32.totalorder %s920_s10, %s643_s7 }
  0x4f   : > { %p640_p5 = pnand %p638_p0, %p624_p9  ;;  %p646_p12 = scmp.lt.s32.totalorder %s644_s4, %s637_s29 }
  0x51   : > { %p641_p7 = pneg %p640_p5  ;;  %p647_p4 = por %p646_p12, %p645_p8 }
  0x53   : > { %p648_p6 = pnand %p647_p4, %p641_p7 }
  0x55   : > { %651 = shalt.err (!%p648_p6)
}
  0x56   : > { %s747_s20 = smov 128   ;;  %s748_s18 = smov 8  }
  0x57   : > { %512 = dma.hbm_to_vmem [thread:$0]  (!%p837_p3), %s913_s9, 384, %s920_s10, %s922_s11, %s747_s20, %s747_s20, %s748_s18  }
  0x58   : > { %p1075_p9 = scmp.ne.s32.totalorder %s1069_s25, 0 }
  0x59   : > { %p1076_p2 = scmp.ne.s32.totalorder (!%p1075_p9), %s1065_s21, 0 }
  0x5a   : > { %200 = sbr.rel (%p1075_p9) target bundleno = 197 (0xc5), region = 32 }
  0x61   : > { %705 = dma.done.wait (%p1076_p2), [#allocation5], 16  }
  0x62   : > { %707 = vsyncadd (%p1076_p2), [#allocation5], 4294967280 }
  0x63   : > { %709 = dma.done.wait (%p1076_p2), [#allocation3], 128  }
  0x64   : > { %711 = vsyncadd (%p1076_p2), [#allocation3], 4294967168  ;;  %s961_s19 = sand.u32 1, %s726_s13   ;;  %p1077_p3 = scmp.ne.s32.totalorder %s1066_s22, 0 }
  0x65   : > { %s488_s25 = smul.u32 24, %s961_s19  ;;  %s211_s26 = scalar_lea.sflag [#allocation8], %s961_s19 }
  0x67   : > { %s214_s9 = scalar_lea.vmem [#allocation7], %s488_s25 }
  0x68   : > { %713 = dma.done.wait (%p1077_p3), %s211_s26, 384  }
  0x69   : > { %715 = vsyncadd (%p1077_p3), %s211_s26, 4294966912 }
  0x6a   : > { %219 = sfence }
  0x6b   : > { %v971_v0 = vld [vmem:[%s214_s9] sm:$0xff]  ;;  %v973_v1 = vld [vmem:[%s214_s9 + $0x8] sm:$0xff]  ;;  %v975_v2 = vld [vmem:[%s214_s9 + $0x10] sm:$0xff]  ;;  %s275_s21 = smul.u32 3, %s734_s15  ;;  %s237_s8 = scalar_lea.vmem [#allocation9], %s488_s25 }
  0x6c   : > { %v243_v3 = vmax.f32 %v971_v0, %v973_v1  ;;  %v245_v4 = vmin.f32 %v971_v0, %v973_v1  ;;  %v255_v9 = vsub.f32 %v973_v1, %v975_v2  ;;  %v258_v10 = vsub.f32 %v975_v2, %v971_v0  ;;  %s357_s29 = sshll.u32 %s237_s8, 4  ;;  %s489_s5 = smul.u32 384, %s734_s15  ;;  %s1000_s29 = int_to_ptr.vmem [resolvable:$true] %s357_s29 }
  0x6d   : > { %v260_v11 = vsub.f32 %v971_v0, %v973_v1  ;;  %s276_s22 = sld [smem:[#allocation2 + %s275_s21]]  ;;  %s279_s10 = sadd.s32 2, %s275_s21 }
  0x6e   : > { %v244_v5 = vmax.f32 %v243_v3, %v975_v2  ;;  %v246_v6 = vmin.f32 %v245_v4, %v975_v2  ;;  %s277_s11 = sadd.s32 1, %s275_s21  ;;  %s280_s27 = sld [smem:[#allocation2 + %s279_s10]]  ;;  %v327_v3 = vld [vmem:[#allocation6] sm:$0xff] }
  0x6f   : > { %s278_s6 = sld [smem:[#allocation2 + %s277_s11]]  ;;  %s1008_s20 = scalar_lea.hbm %s1059_s3, %s489_s5 }
  0x70   : > { %v247_v7 = vsub.f32 %v244_v5, %v246_v6  ;;  %vm248_vm1 = vcmp.gt.f32.partialorder %v244_v5, 0.0  ;;  %vm268_vm2 = vcmp.ge.f32.partialorder %v973_v1, %v244_v5  ;;  %vm263_vm3 = vcmp.ge.f32.partialorder %v971_v0, %v244_v5  ;;  %s343_s15 = scalar_lea.sflag [#allocation4], %s961_s19  ;;  %s652_s18 = scalar_lea.vmem %s1000_s29, 384 }
  0x71   : > { %v249_v21 = vsel %vm248_vm1, %v244_v5, 1.0  ;;  %p653_p10 = scmp.ne.s32.totalorder %s1000_s29, %s652_s18  ;;  %p1078_p11 = scmp.ne.s32.totalorder %s1067_s23, 0 }
  0x72   : > { %vm253_vm0 = vcmp.gt.f32.partialorder %v247_v7, 0.0  ;;  %vm262_vm4 = vcmp.le.f32.partialorder %v247_v7, 0.0  ;;  %s749_s25 = smov [#allocation9]  }
  0x73   : > { %v254_v8 = vsel %vm253_vm0, %v247_v7, 1.0  ;;  %v281_v26 = vstv %s276_s22  ;;  %p654_p13 = pnand %p653_p10, %p1078_p11  ;;  %s656_s26 = sshll.u32 %s749_s25, 4  ;;  %s657_s26 = int_to_ptr.vmem [resolvable:$false] %s656_s26 }
  0x74   : > { %577 = vrcp.f32 %v254_v8  ;;  %v291_v36 = vstv %s280_s27  ;;  %s658_s9 = scalar_lea.vmem %s657_s26, 768  ;;  %p659_p0 = scmp.lt.s32.totalorder %s1000_s29, %s657_s26 }
  0x75   : > { %579 = vrcp.f32 %v249_v21  ;;  %v288_v39 = vstv %s278_s6  ;;  %v292_v41 = vmul.f32 %v291_v36, %v244_v5  ;;  %p655_p1 = pneg %p654_p13  ;;  %p660_p5 = scmp.lt.s32.totalorder %s658_s9, %s652_s18 }
  0x77   : > { %v293_v46 = vmax.f32 %v292_v41, 0.0  ;;  %p661_p7 = por %p660_p5, %p659_p0 }
  0x79   : > { %p662_p8 = pnand %p661_p7, %p655_p1 }
  0x7e   : > { %v578_v12 = vpop.eup %577 }
  0x7f   : > { %v257_v13 = vmul.f32 %v578_v12, %v255_v9  ;;  %v259_v14 = vmul.f32 %v578_v12, %v258_v10  ;;  %v261_v15 = vmul.f32 %v578_v12, %v260_v11  ;;  %v580_v31 = vpop.eup %579 }
  0x80   : > { %v251_v34 = vmul.f32 %v580_v31, %v247_v7 }
  0x81   : > { %v264_v16 = vmul.f32 0.16666667, %v257_v13  ;;  %v269_v17 = vadd.f32 2.0, %v259_v14  ;;  %v270_v18 = vadd.f32 4.0, %v261_v15 }
  0x82   : > { %v252_v38 = vsel %vm248_vm1, %v251_v34, 0.0 }
  0x83   : > { %v265_v19 = vfloor.f32 %v264_v16  ;;  %v271_v22 = vsel %vm268_vm2, %v269_v17, %v270_v18  ;;  %v289_v42 = vmul.f32 %v288_v39, %v252_v38 }
  0x85   : > { %v266_v20 = vmul.f32 6.0, %v265_v19  ;;  %v290_v47 = vmax.f32 %v289_v42, 0.0 }
  0x87   : > { %v267_v23 = vsub.f32 %v257_v13, %v266_v20  ;;  %v294_v50 = vmul.f32 %v293_v46, %v290_v47 }
  0x89   : > { %v272_v24 = vsel %vm263_vm3, %v267_v23, %v271_v22  ;;  %v304_v54 = vsub.f32 %v293_v46, %v294_v50 }
  0x8a   : > { %v273_v25 = vsel %vm262_vm4, 0.0, %v272_v24 }
  0x8b   : > { %v274_v27 = vmul.f32 60.0, %v273_v25 }
  0x8d   : > { %v282_v28 = vadd.f32 %v281_v26, %v274_v27 }
  0x8f   : > { %v283_v29 = vadd.f32 360.0, %v282_v28 }
  0x91   : > { %v284_v30 = vmul.f32 0.0027777778, %v283_v29 }
  0x93   : > { %v285_v32 = vfloor.f32 %v284_v30 }
  0x95   : > { %v286_v33 = vmul.f32 360.0, %v285_v32 }
  0x97   : > { %v287_v35 = vsub.f32 %v283_v29, %v286_v33 }
  0x99   : > { %v295_v37 = vmul.f32 0.016666668, %v287_v35 }
  0x9b   : > { %v296_v40 = vmul.f32 0.5, %v295_v37  ;;  %v305_v44 = vfloor.f32 %v295_v37 }
  0x9d   : > { %v297_v43 = vfloor.f32 %v296_v40  ;;  %vm306_vm5 = vcmp.eq.f32.partialorder %v305_v44, 0.0  ;;  %vm307_vm6 = vcmp.eq.f32.partialorder %v305_v44, 5.0  ;;  %vm309_vm7 = vcmp.eq.f32.partialorder %v305_v44, 1.0 }
  0x9e   : > { %vm310_vm8 = vcmp.eq.f32.partialorder %v305_v44, 4.0  ;;  %vm314_vm9 = vcmp.eq.f32.partialorder %v305_v44, 2.0  ;;  %vm308_vm10 = vmor %vm306_vm5, %vm307_vm6  ;;  %vm316_vm11 = vcmp.eq.f32.partialorder %v305_v44, 3.0 }
  0x9f   : > { %v298_v45 = vmul.f32 2.0, %v297_v43  ;;  %vm311_vm12 = vmor %vm309_vm7, %vm310_vm8 }
  0xa0   : > { %vm315_vm13 = vmor %vm309_vm7, %vm314_vm9 }
  0xa1   : > { %v299_v48 = vsub.f32 %v295_v37, %v298_v45  ;;  %vm317_vm14 = vmor %vm306_vm5, %vm316_vm11 }
  0xa2   : > { %vm321_vm15 = vmor %vm314_vm9, %vm307_vm6 }
  0xa3   : > { %v480_v49 = vadd.f32 -1.0, %v299_v48  ;;  %vm320_vm0 = vmor %vm316_vm11, %vm310_vm8 }
  0xa5   : > { %v301_v51 = vand.u32 2147483647, %v480_v49 }
  0xa7   : > { %v302_v52 = vsub.f32 1.0, %v301_v51 }
  0xa9   : > { %v303_v53 = vmul.f32 %v302_v52, %v294_v50 }
  0xab   : > { %v312_v55 = vsel %vm311_vm12, %v303_v53, 0.0  ;;  %v318_v56 = vsel %vm317_vm14, %v303_v53, 0.0  ;;  %v322_v57 = vsel %vm321_vm15, %v303_v53, 0.0 }
  0xac   : > { %v313_v58 = vsel %vm308_vm10, %v294_v50, %v312_v55  ;;  %v319_v59 = vsel %vm315_vm13, %v294_v50, %v318_v56  ;;  %v323_v60 = vsel %vm320_vm0, %v294_v50, %v322_v57 }
  0xad   : > { %v324_v61 = vadd.f32 %v313_v58, %v304_v54  ;;  %v325_v62 = vadd.f32 %v319_v59, %v304_v54  ;;  %v326_v63 = vadd.f32 %v323_v60, %v304_v54 }
  0xaf   : > { %v328_v4 = vsub.f32 %v324_v61, %v971_v0  ;;  %v331_v5 = vsub.f32 %v325_v62, %v973_v1  ;;  %v334_v6 = vsub.f32 %v326_v63, %v975_v2 }
  0xb1   : > { %v329_v7 = vmul.f32 %v328_v4, %v327_v3  ;;  %v332_v8 = vmul.f32 %v331_v5, %v327_v3  ;;  %v335_v9 = vmul.f32 %v334_v6, %v327_v3 }
  0xb3   : > { %v330_v10 = vadd.f32 %v329_v7, %v971_v0  ;;  %v333_v11 = vadd.f32 %v973_v1, %v332_v8  ;;  %v336_v12 = vadd.f32 %v975_v2, %v335_v9 }
  0xb5   : > { %337 = vst [vmem:[%s237_s8] sm:$0xff] %v330_v10  ;;  %481 = vst [vmem:[%s237_s8 + $0x8] sm:$0xff] %v333_v11 }
  0xb6   : > { %482 = vst [vmem:[%s237_s8 + $0x10] sm:$0xff] %v336_v12 }
  0xb7   : > { %665 = shalt.err (!%p662_p8)
}
  0xb8   : > { %s666_s21 = scalar_lea.hbm %s1008_s20, 384  ;;  %s670_s11 = scalar_lea.hbm %s1059_s3, 1536 }
  0xb9   : > { %p667_p12 = scmp.ne.s32.totalorder %s1008_s20, %s666_s21  ;;  %p671_p9 = scmp.lt.u32.totalorder %s1008_s20, %s1059_s3 }
  0xba   : > { %p672_p2 = scmp.lt.u32.totalorder %s670_s11, %s666_s21  ;;  %p674_p10 = scmp.lt.u32.totalorder %s666_s21, %s1008_s20 }
  0xbb   : > { %p668_p4 = pnand %p667_p12, %p1078_p11 }
  0xbc   : > { %p673_p3 = por %p672_p2, %p671_p9 }
  0xbd   : > { %p669_p6 = pneg %p668_p4 }
  0xbe   : > { %p675_p13 = por %p674_p10, %p673_p3 }
  0xc0   : > { %p676_p1 = pnand %p675_p13, %p669_p6 }
  0xc2   : > { %679 = shalt.err (!%p676_p1)
}
  0xc3   : > { %s750_s8 = smov 128   ;;  %s751_s5 = smov 8  }
  0xc4   : > { %500 = dma.vmem_to_hbm [thread:$0]  (%p1078_p11), %s1000_s29, 384, %s1008_s20, %s343_s15, %s750_s8, %s750_s8, %s751_s5  }
  0xc5 PF: > { %p522_p0 = scmp.ge.s32.totalorder %s742_s17, 2  ;;  %s372_s7 = sand.u32 1, %s722_s12  }
  0xc6   : > { %p1079_p5 = scmp.ne.s32.totalorder %s1068_s24, 0  ;;  %s373_s4 = scalar_lea.sflag [#allocation4], %s372_s7 }
  0xc8   : > { %p514_p7 = pnand %p522_p0, %p1079_p5 }
  0xca   : > { %717 = dma.done.wait (!%p514_p7), %s373_s4, 384  }
  0xcb   : > { %719 = vsyncadd (!%p514_p7), %s373_s4, 4294966912  ;;  %s21_s17 = sadd.s32 1, %s742_s17   ;;  %s1080_s12 = smov %s726_s13 }
  0xcc   : > { %p18_p8 = scmp.ge.s32.totalorder %s21_s17, 6   ;;  %s1081_s13 = smov %s730_s14 }
  0xcd   : > { %s1082_s14 = smov %s918_s28  ;;  %s1083_s15 = smov %s738_s16 }
  0xce   : > { %s1084_s16 = smov %s1086_s30  ;;  %20 = sbr.rel (!%p18_p8) target bundleno = 8 (0x8), region = 92 }
  0xd5   :  { %378 = vsyncpa [#allocation3], 1 }
  0xd6   :  { %380 = vsyncpa [#allocation3 + $0x1], 1 }
  0xd7   :  { %381 = vsyncpa [#allocation8], 1 }
  0xd8   :  { %383 = vsyncpa [#allocation8 + $0x1], 1 }
  0xd9   :  { %384 = vsyncpa [#allocation4], 1 }
  0xda   :  { %386 = vsyncpa [#allocation4 + $0x1], 1 }
  0xdb   :  { %387 = vsyncpa [#allocation5], 1 }
  0xdc   :  { %389 = vsyncpa [#allocation5 + $0x1], 1 }

</bundles_post_ra>
